<compile_context>
chip_gen: v5e
topology: v5e:2x2
jax: 0.10.0
libtpu: 0.0.40
codegen_flags: <defaults>
</compile_context>

<pallas_src>
import functools

import jax
import jax.numpy as jnp
from jax.experimental import pallas as pl
from jax.experimental.pallas import tpu as pltpu

_SUBLANE = 8  # row tiles padded to a multiple of the sublane width


def _round_up(x, m):
    return (x + m - 1) // m * m


def _mlp_kernel(x_ref, w1_ref, b1_ref, w2_ref, b2_ref, o_ref, *, use_bf16):
    # x_ref: (TILE_N, IN); w1_ref: (IN, HID); b1_ref: (1, HID)
    # w2_ref: (HID, OUT); b2_ref: (1, OUT);  o_ref: (TILE_N, OUT)
    x = x_ref[...]
    w1 = w1_ref[...]
    w2 = w2_ref[...]
    if use_bf16:
        # bf16 MXU operands (v6e/v7x), f32 accumulation.  Saves no HBM bytes:
        # operands already arrived in their HBM dtype; feed bf16 arrays from the
        # caller if HBM traffic is the target.
        x = x.astype(jnp.bfloat16)
        w1 = w1.astype(jnp.bfloat16)
        w2 = w2.astype(jnp.bfloat16)

    h = jnp.dot(x, w1, preferred_element_type=jnp.float32)
    h = h + b1_ref[...].astype(jnp.float32)
    h = jnp.maximum(h, 0.0)  # ReLU in f32 on the VPU
    if use_bf16:
        h = h.astype(jnp.bfloat16)
    out = jnp.dot(h, w2, preferred_element_type=jnp.float32)
    out = out + b2_ref[...].astype(jnp.float32)
    o_ref[...] = out.astype(o_ref.dtype)


def _pick_tile_n(n):
    """Single block for small n; >=4 grid steps for larger n, capped at 2048 rows."""
    if n < 256:
        return _round_up(max(n, _SUBLANE), _SUBLANE)
    return min(2048, _round_up(pl.cdiv(n, 4), _SUBLANE))


@functools.partial(jax.jit, static_argnames=("tile_n", "use_bf16"))
def mlp_forward(x, params, *, tile_n=None, use_bf16=False):
    """x: (..., in_dim). Returns (..., out_dim). Fused Linear-ReLU-Linear."""
    w1, b1, w2, b2 = params
    in_dim, hidden = w1.shape
    out_dim = w2.shape[1]

    lead_shape = x.shape[:-1]
    x2d = x.reshape(-1, in_dim)
    n = x2d.shape[0]

    if tile_n is None:
        tile_n = _pick_tile_n(n)
    tile_n = min(_round_up(tile_n, _SUBLANE), _round_up(n, _SUBLANE))
    grid = (pl.cdiv(n, tile_n),)  # trailing partial block handled by Pallas masking

    kernel = functools.partial(_mlp_kernel, use_bf16=use_bf16)

    itemsize = jnp.dtype(x2d.dtype).itemsize
    flops = 2 * n * (in_dim * hidden + hidden * out_dim)
    bytes_accessed = (
        (n * in_dim + in_dim * hidden + hidden + hidden * out_dim + out_dim) * itemsize
        + n * out_dim * itemsize
    )

    y2d = pl.pallas_call(
        kernel,
        out_shape=jax.ShapeDtypeStruct((n, out_dim), x2d.dtype),
        grid_spec=pltpu.PrefetchScalarGridSpec(
            num_scalar_prefetch=0,
            grid=grid,
            in_specs=[
                pl.BlockSpec((tile_n, in_dim), lambda i: (i, 0)),   # x row tile
                pl.BlockSpec((in_dim, hidden), lambda i: (0, 0)),   # full W1 (resident)
                pl.BlockSpec((1, hidden), lambda i: (0, 0)),        # b1
                pl.BlockSpec((hidden, out_dim), lambda i: (0, 0)),  # full W2 (resident)
                pl.BlockSpec((1, out_dim), lambda i: (0, 0)),       # b2
            ],
            out_specs=pl.BlockSpec((tile_n, out_dim), lambda i: (i, 0)),
        ),
        compiler_params=pltpu.CompilerParams(
            dimension_semantics=("parallel",),   # row grid shards across TCs on v7x
            vmem_limit_bytes=32 * 1024 * 1024,   # explicit; tiles here use ~1 MiB
        ),
        cost_estimate=pl.CostEstimate(
            flops=flops, transcendentals=0, bytes_accessed=bytes_accessed
        ),
    )(x2d, w1, b1, w2, b2)

    return y2d.reshape(*lead_shape, out_dim)


def init_linear_params(key, in_features, out_features, dtype=jnp.float32):
    """Deterministic init mirroring torch.nn.Linear default (uniform +/- 1/sqrt(in)).
    Stored as (in_features, out_features) so the kernel computes x @ W + b,
    equivalent to torch's x @ W.T with W of shape (out, in)."""
    kw, kb = jax.random.split(key)
    bound = 1.0 / jnp.sqrt(jnp.asarray(in_features, dtype))
    w = jax.random.uniform(kw, (in_features, out_features), dtype, -bound, bound)
    b = jax.random.uniform(kb, (1, out_features), dtype, -bound, bound)
    return w, b


def _reference(x, params):
    w1, b1, w2, b2 = params
    x2d = x.reshape(-1, w1.shape[0])
    ref = jnp.maximum(x2d @ w1 + b1, 0.0) @ w2 + b2
    return ref.reshape(*x.shape[:-1], w2.shape[1])


if __name__ == "__main__":
    key = jax.random.PRNGKey(0)
    k_x, k_x2, k_l1, k_l2 = jax.random.split(key, 4)

    batch, seq, in_dim, hidden, out_dim = 2, 8, 32, 64, 32

    w1, b1 = init_linear_params(k_l1, in_dim, hidden)
    w2, b2 = init_linear_params(k_l2, hidden, out_dim)
    params = (w1, b1, w2, b2)

    # Case 1: small input -> single full block (grid=(1,)), f32 operands, no padding.
    x = jax.random.normal(k_x, (batch, seq, in_dim), jnp.float32)
    y = mlp_forward(x, params)
    y = jax.block_until_ready(y)
    ref = _reference(x, params)
    assert y.shape == (batch, seq, out_dim)
    assert jnp.allclose(y, ref, atol=1e-5, rtol=1e-5)

    # Case 2: ragged row count (150 rows, tile_n=64 -> grid=(3,), last block masked).
    x2 = jax.random.normal(k_x2, (3, 50, in_dim), jnp.float32)
    y2 = mlp_forward(x2, params, tile_n=64)
    y2 = jax.block_until_ready(y2)
    ref2 = _reference(x2, params)
    assert y2.shape == (3, 50, out_dim)
    assert jnp.allclose(y2, ref2, atol=1e-5, rtol=1e-5)

    print("KERNEL_OK")
</pallas_src>

<mosaic_0001>
module attributes {stable_mosaic.version = 11 : i64} {
  func.func @_mlp_kernel(%arg0: i32, %arg1: memref<16x32xf32, #tpu.memory_space<vmem>>, %arg2: memref<32x64xf32, #tpu.memory_space<vmem>>, %arg3: memref<1x64xf32, #tpu.memory_space<vmem>>, %arg4: memref<64x32xf32, #tpu.memory_space<vmem>>, %arg5: memref<1x32xf32, #tpu.memory_space<vmem>>, %arg6: memref<16x32xf32, #tpu.memory_space<vmem>>) attributes {dimension_semantics = [#tpu.dimension_semantics<parallel>], iteration_bounds = array<i64: 1>, scalar_prefetch = 0 : i64, scratch_operands = 0 : i64, tpu.core_type = #tpu.core_type<tc>, window_params = [{transform_indices = @transform_0, window_bounds = array<i64: 16, 32>}, {pipeline_mode = #tpu.pipeline_mode<synchronous>, transform_indices = @transform_1, window_bounds = array<i64: 32, 64>}, {pipeline_mode = #tpu.pipeline_mode<synchronous>, transform_indices = @transform_2, window_bounds = array<i64: 1, 64>}, {pipeline_mode = #tpu.pipeline_mode<synchronous>, transform_indices = @transform_3, window_bounds = array<i64: 64, 32>}, {pipeline_mode = #tpu.pipeline_mode<synchronous>, transform_indices = @transform_4, window_bounds = array<i64: 1, 32>}, {transform_indices = @transform_5, window_bounds = array<i64: 16, 32>}]} {
    %c0 = arith.constant 0 : index
    %c0_0 = arith.constant 0 : index
    %0 = vector.load %arg1[%c0, %c0_0] : memref<16x32xf32, #tpu.memory_space<vmem>>, vector<16x32xf32>
    %c0_1 = arith.constant 0 : index
    %c0_2 = arith.constant 0 : index
    %1 = vector.load %arg2[%c0_1, %c0_2] : memref<32x64xf32, #tpu.memory_space<vmem>>, vector<32x64xf32>
    %c0_3 = arith.constant 0 : index
    %c0_4 = arith.constant 0 : index
    %2 = vector.load %arg4[%c0_3, %c0_4] : memref<64x32xf32, #tpu.memory_space<vmem>>, vector<64x32xf32>
    %cst = arith.constant dense<0.000000e+00> : vector<16x64xf32>
    %3 = tpu.matmul %0, %1, %cst {dimension_numbers = #tpu.dot_dimension_numbers<[1], [0], [0], [1], [0, 0, 1, 1], [], []>} : vector<16x32xf32>, vector<32x64xf32>, vector<16x64xf32> -> vector<16x64xf32>
    %c0_5 = arith.constant 0 : index
    %c0_6 = arith.constant 0 : index
    %4 = vector.load %arg3[%c0_5, %c0_6] : memref<1x64xf32, #tpu.memory_space<vmem>>, vector<1x64xf32>
    %5 = vector.broadcast %4 : vector<1x64xf32> to vector<16x64xf32>
    %6 = arith.addf %3, %5 : vector<16x64xf32>
    %cst_7 = arith.constant 0.000000e+00 : f32
    %7 = vector.broadcast %cst_7 : f32 to vector<16x64xf32>
    %8 = arith.maximumf %6, %7 : vector<16x64xf32>
    %cst_8 = arith.constant dense<0.000000e+00> : vector<16x32xf32>
    %9 = tpu.matmul %8, %2, %cst_8 {dimension_numbers = #tpu.dot_dimension_numbers<[1], [0], [0], [1], [0, 0, 1, 1], [], []>} : vector<16x64xf32>, vector<64x32xf32>, vector<16x32xf32> -> vector<16x32xf32>
    %c0_9 = arith.constant 0 : index
    %c0_10 = arith.constant 0 : index
    %10 = vector.load %arg5[%c0_9, %c0_10] : memref<1x32xf32, #tpu.memory_space<vmem>>, vector<1x32xf32>
    %11 = vector.broadcast %10 : vector<1x32xf32> to vector<16x32xf32>
    %12 = arith.addf %9, %11 : vector<16x32xf32>
    %c0_11 = arith.constant 0 : index
    %c0_12 = arith.constant 0 : index
    %13 = vector.load %arg6[%c0_11, %c0_12] : memref<16x32xf32, #tpu.memory_space<vmem>>, vector<16x32xf32>
    tpu.vector_store %arg6[%c0_11, %c0_12], %12 {strides = array<i32>} : memref<16x32xf32, #tpu.memory_space<vmem>>, vector<16x32xf32>,
    return
  }
  func.func @transform_0(%arg0: i32) -> (i32, i32) {
    %c0_i32 = arith.constant 0 : i32
    %c0_i32_0 = arith.constant 0 : i32
    return %arg0, %c0_i32 : i32, i32
  }
  func.func @transform_1(%arg0: i32) -> (i32, i32) {
    %c0_i32 = arith.constant 0 : i32
    %c0_i32_0 = arith.constant 0 : i32
    %c0_i32_1 = arith.constant 0 : i32
    return %c0_i32, %c0_i32_0 : i32, i32
  }
  func.func @transform_2(%arg0: i32) -> (i32, i32) {
    %c0_i32 = arith.constant 0 : i32
    %c0_i32_0 = arith.constant 0 : i32
    %c0_i32_1 = arith.constant 0 : i32
    return %c0_i32, %c0_i32_0 : i32, i32
  }
  func.func @transform_3(%arg0: i32) -> (i32, i32) {
    %c0_i32 = arith.constant 0 : i32
    %c0_i32_0 = arith.constant 0 : i32
    %c0_i32_1 = arith.constant 0 : i32
    return %c0_i32, %c0_i32_0 : i32, i32
  }
  func.func @transform_4(%arg0: i32) -> (i32, i32) {
    %c0_i32 = arith.constant 0 : i32
    %c0_i32_0 = arith.constant 0 : i32
    %c0_i32_1 = arith.constant 0 : i32
    return %c0_i32, %c0_i32_0 : i32, i32
  }
  func.func @transform_5(%arg0: i32) -> (i32, i32) {
    %c0_i32 = arith.constant 0 : i32
    %c0_i32_0 = arith.constant 0 : i32
    return %arg0, %c0_i32 : i32, i32
  }
}

</mosaic_0001>

<bundles_post_ra>
// kernel: mlp_forward.1
= control target key start
LH: loop header
LB: loop body
LE: loop exit
PB: predicated region body
PF: predicated region fallthrough
CT: control target
= control target key end

     0   :  { %s260_s0 = inlined_call_operand.vmem [shape: f32[16,32], index: 0, kind: input, shape index: {}]   ;;  %s261_s1 = inlined_call_operand.vmem [shape: f32[32,64], index: 1, kind: input, shape index: {}]   ;;  %s262_s2 = inlined_call_operand.vmem [shape: f32[1,64], index: 2, kind: input, shape index: {}]   ;;  %s263_s3 = inlined_call_operand.vmem [shape: f32[64,32], index: 3, kind: input, shape index: {}]   ;;  %s264_s4 = inlined_call_operand.vmem [shape: f32[1,32], index: 4, kind: input, shape index: {}]   ;;  %s265_s5 = inlined_call_operand.hbm [shape: f32[16,32], index: 5, kind: output, shape index: {}]  }
   0x1   :  { %v26_v0 = vld [vmem:[%s261_s1 + $0x18] sm:$0xff]  ;;  %v25_v1 = vld [vmem:[%s261_s1 + $0x10] sm:$0xff]  ;;  %v24_v2 = vld [vmem:[%s261_s1 + $0x8] sm:$0xff] }
   0x2   :  { %129 = vmatpush.msra.mxu3 %v26_v0  ;;  %58 = vmatpush.msra.mxu0 %v26_v0  ;;  %v34_v3 = vld [vmem:[%s263_s3 + $0x38] sm:$0xff]  ;;  %v33_v4 = vld [vmem:[%s263_s3 + $0x30] sm:$0xff]  ;;  %v23_v5 = vld [vmem:[%s261_s1] sm:$0xff] }
   0x3   :  { %133 = vmatpush.msra.mxu2 %v34_v3  ;;  %90 = vmatpush.msra.mxu1 %v34_v3 }
   0x4   :  { %130 = vmatpush.msra.mxu3 %v25_v1  ;;  %59 = vmatpush.msra.mxu0 %v25_v1 }
   0x5   :  { %10 = vsyncpa [#allocation3], 0  ;;  %v22_v6 = vld [vmem:[%s260_s0 + $0x8] sm:$0xff]  ;;  %vm39_vm0 = vcmask 261120   ;;  %v21_v7 = vld [vmem:[%s260_s0] sm:$0xff]  ;;  %134 = vmatpush.msra.mxu2 %v33_v4  ;;  %91 = vmatpush.msra.mxu1 %v33_v4  ;;  %vm75_vm1 = vcmask 523264  }
   0x6   :  { %131 = vmatpush.msra.mxu3 %v24_v2  ;;  %60 = vmatpush.msra.mxu0 %v24_v2  ;;  %v32_v8 = vld [vmem:[%s263_s3 + $0x28] sm:$0xff]  ;;  %v31_v9 = vld [vmem:[%s263_s3 + $0x20] sm:$0xff]  ;;  %v30_v10 = vld [vmem:[%s263_s3 + $0x18] sm:$0xff]  ;;  %s113_s25 = sshll.u32 %s265_s5, 4  ;;  %s173_s26 = smov 128   ;;  %s114_s25 = int_to_ptr.hbm [resolvable:$true] %s113_s25 }
   0x7   :  { %135 = vmatpush.msra.mxu2 %v32_v8  ;;  %92 = vmatpush.msra.mxu1 %v32_v8  ;;  %v29_v11 = vld [vmem:[%s263_s3 + $0x10] sm:$0xff]  ;;  %v28_v12 = vld [vmem:[%s263_s3 + $0x8] sm:$0xff]  ;;  %v27_v13 = vld [vmem:[%s263_s3] sm:$0xff]  ;;  %s172_s3 = smov [#allocation2]   ;;  %s174_s27 = smov 8  }
   0x8   :  { %132 = vmatpush.msra.mxu3 %v23_v5  ;;  %61 = vmatpush.msra.mxu0 %v23_v5  ;;  %v144_v14 = vld [vmem:[%s262_s2] ss:$0 sm:$0xff]  ;;  %s111_s23 = sshll.u32 %s172_s3, 4  ;;  %s112_s23 = int_to_ptr.vmem [resolvable:$true] %s111_s23 }
   0x9   :  { %126 = vmatmul.msk.f32.vlgmr.msra.gmra.mxu3 %vm39_vm0, %v22_v6  ;;  %125 = vmatmul.msk.f32.vlgmr.msra.gmra.mxu0 %vm39_vm0, %v21_v7  ;;  %v145_v21 = vld [vmem:[%s264_s4] ss:$0 sm:$0xff] }
   0xa   :  { %136 = vmatpush.msra.mxu2 %v31_v9  ;;  %93 = vmatpush.msra.mxu1 %v31_v9 }
   0xc   :  { %137 = vmatpush.msra.mxu2 %v30_v10  ;;  %94 = vmatpush.msra.mxu1 %v30_v10 }
   0xe   :  { %138 = vmatpush.msra.mxu2 %v29_v11  ;;  %95 = vmatpush.msra.mxu1 %v29_v11 }
  0x10   :  { %139 = vmatpush.msra.mxu2 %v28_v12  ;;  %96 = vmatpush.msra.mxu1 %v28_v12 }
  0x12   :  { %140 = vmatpush.msra.mxu2 %v27_v13  ;;  %97 = vmatpush.msra.mxu1 %v27_v13 }
  0x86   :  { %v63_v15 = vpop.f32.mrf.mxu0 }
  0x87   :  { %v64_v16 = vadd.f32 %v144_v14, %v63_v15 }
  0x89   :  { %v69_v17 = vmax.f32 %v64_v16, 0.0 }
  0x8b   :  { %127 = vmatmul.msk.f32.vlgmr.msra.gmra.mxu1 %vm75_vm1, %v69_v17 }
  0x8c   :  { %v66_v18 = vpop.f32.mrf.mxu3 }
  0x8d   :  { %v67_v19 = vadd.f32 %v144_v14, %v66_v18 }
  0x8f   :  { %v70_v20 = vmax.f32 %v67_v19, 0.0 }
  0x91   :  { %128 = vmatmul.msk.f32.vlgmr.msra.gmra.mxu2 %vm75_vm1, %v70_v20 }
 0x108   :  { %v99_v22 = vpop.f32.mrf.mxu1 }
 0x109   :  { %v100_v23 = vadd.f32 %v145_v21, %v99_v22 }
 0x10b   :  { %105 = vst.msk [vmem:[#allocation2] sm:$0xff] %vm39_vm0, %v100_v23 }
 0x114   :  { %v102_v24 = vpop.f32.mrf.mxu2 }
 0x115   :  { %v103_v25 = vadd.f32 %v145_v21, %v102_v24 }
 0x117   :  { %106 = vst.msk [vmem:[#allocation2 + $0x8] sm:$0xff] %vm39_vm0, %v103_v25 }
 0x118   :  { %119 = dma.vmem_to_hbm [thread:$0]  %s112_s23, 256, %s114_s25, [#allocation3], %s173_s26, %s173_s26, %s174_s27  }
 0x119   :  { %170 = dma.done.wait [#allocation3], 256  }
 0x11a   :  { %171 = vsyncadd [#allocation3], 4294967040 }
 0x11b   :  { %124 = vsyncpa [#allocation3], 1 }

</bundles_post_ra>
